<compile_context>
chip_gen: v5e
topology: v5e:2x2
jax: 0.10.0
libtpu: 0.0.40
codegen_flags: <defaults>
</compile_context>

<pallas_src>
import jax
import jax.numpy as jnp
import numpy as np
from jax.experimental import pallas as pl
from jax.experimental.pallas import tpu as pltpu

ALPHA = 0.5
GAMMA = 2
SMOOTH = 1e-6

LANES = 128
MAX_TILE_ROWS = 512      # rows of 128 lanes per grid step (bounded VMEM footprint)


def _cdiv(a, b):
    return (a + b - 1) // b


def _make_kernel(B, C, n_pix, n_pix_pad, tile_rows, n_tiles):
    """Build the loss kernel with all static sizes baked in as Python constants."""
    assert C == 2

    # alpha folding: with ALPHA == 0.5, alpha_t is identically 0.5 -> fold it
    # into the final mean scale instead of a per-pixel multiply.
    if ALPHA == 0.5:
        alpha_fold = 0.5
        per_pixel_alpha = False
    elif ALPHA >= 0:
        alpha_fold = 1.0
        per_pixel_alpha = True
    else:
        alpha_fold = 1.0
        per_pixel_alpha = False

    focal_scale = float(alpha_fold) / float(B * n_pix)
    dice_scale = 1.0 / float(B)
    padded = n_pix_pad != n_pix

    def kernel(pred_ref, mask_ref, out_ref, facc, iacc, uacc, dacc):
        b = pl.program_id(0)
        s = pl.program_id(1)
        nb = pl.num_programs(0)
        ns = pl.num_programs(1)

        @pl.when(jnp.logical_and(b == 0, s == 0))
        def _():
            facc[...] = jnp.zeros_like(facc)
            dacc[...] = jnp.zeros_like(dacc)

        @pl.when(s == 0)                       # new batch element: reset dice partials
        def _():
            iacc[...] = jnp.zeros_like(iacc)
            uacc[...] = jnp.zeros_like(uacc)

        x0 = pred_ref[0, 0].astype(jnp.float32)   # (tile_rows, 128) logits class 0
        x1 = pred_ref[0, 1].astype(jnp.float32)   # (tile_rows, 128) logits class 1
        m = mask_ref[0].astype(jnp.float32)       # (tile_rows, 128) target in {0, 1}
        is_one = m > 0.5

        # numerically-stable 2-class softmax: 2 exp + 1 log + 1 reciprocal (EUP)
        x_max = jnp.maximum(x0, x1)
        e0 = jnp.exp(x0 - x_max)
        e1 = jnp.exp(x1 - x_max)
        sum_e = e0 + e1
        inv = pl.reciprocal(sum_e, approx=False)
        p1 = e1 * inv                             # softmax channel 1 (for dice)
        p_t = jnp.where(is_one, p1, e0 * inv)     # prob of the target class
        x_t = jnp.where(is_one, x1, x0)           # logit of the target class

        ce = jnp.log(sum_e) + (x_max - x_t)       # -log softmax(target)
        q = 1.0 - p_t
        focal = ce * (q * q)                      # GAMMA == 2 -> explicit multiply
        if per_pixel_alpha:
            focal = (ALPHA * m + (1.0 - ALPHA) * (1.0 - m)) * focal

        if padded:                                # mask out the padded tail pixels
            base = s * (tile_rows * LANES)
            flat = (base
                    + jax.lax.broadcasted_iota(jnp.int32, (tile_rows, LANES), 0) * LANES
                    + jax.lax.broadcasted_iota(jnp.int32, (tile_rows, LANES), 1))
            valid = (flat < n_pix).astype(jnp.float32)
            focal = focal * valid
            p1 = p1 * valid        # m is already zero-padded in the tail

        # element-wise (VPU-only) partial accumulation; XLU reduces are deferred
        facc[...] += focal
        iacc[...] += p1 * m
        uacc[...] += p1 + m

        @pl.when(s == ns - 1)      # finalize dice for this batch element
        def _():
            inter = jnp.sum(iacc[...], keepdims=True)    # (1, 1)
            union = jnp.sum(uacc[...], keepdims=True)    # (1, 1)
            dacc[...] += (2.0 * inter + SMOOTH) / (union + SMOOTH)

        @pl.when(jnp.logical_and(b == nb - 1, s == ns - 1))
        def _():
            focal_mean = jnp.sum(facc[...], keepdims=True) * focal_scale
            dice_loss = 1.0 - dacc[...] * dice_scale
            out_ref[...] = dice_loss + focal_mean

    return kernel


def my_loss(pred, mask):
    """pred: [B, C, H, W], mask: [B, H, W] with values {0, 1} -> scalar loss."""
    B, C, H, W = pred.shape
    assert C == 2, "binary-segmentation loss: dice uses softmax channel 1"

    n_pix = H * W
    rows = _cdiv(n_pix, LANES)
    if rows <= MAX_TILE_ROWS:
        tile_rows = rows                      # whole image in one spatial tile
        n_tiles = 1
    else:
        tile_rows = MAX_TILE_ROWS             # multiple of 8, bounded VMEM
        n_tiles = _cdiv(rows, tile_rows)
    rows_pad = n_tiles * tile_rows
    n_pix_pad = rows_pad * LANES

    # lane-dense layout: flatten H*W, pad to a multiple of 128, expose as
    # (rows, 128).  Inputs of any dtype are accepted (cast to f32 in-kernel),
    # so callers can feed bf16 pred / int8 mask to halve HBM traffic.
    pred_flat = pred.reshape(B, C, n_pix)
    mask_flat = mask.reshape(B, n_pix)
    if n_pix_pad != n_pix:
        pad = n_pix_pad - n_pix
        pred_flat = jnp.pad(pred_flat, ((0, 0), (0, 0), (0, pad)))
        mask_flat = jnp.pad(mask_flat, ((0, 0), (0, pad)))
    pred_t = pred_flat.reshape(B, C, rows_pad, LANES)
    mask_t = mask_flat.reshape(B, rows_pad, LANES)

    kernel = _make_kernel(B, C, n_pix, n_pix_pad, tile_rows, n_tiles)

    # TODO(synk): on v7x, a leading "parallel" axis with per-core partial outputs
    #             would use both TensorCores; kept single-core for portability.
    out = pl.pallas_call(
        kernel,
        out_shape=jax.ShapeDtypeStruct((1, 1), jnp.float32),
        grid_spec=pltpu.PrefetchScalarGridSpec(
            num_scalar_prefetch=0,
            grid=(B, n_tiles),
            in_specs=[
                pl.BlockSpec((1, C, tile_rows, LANES), lambda b, s: (b, 0, s, 0)),
                pl.BlockSpec((1, tile_rows, LANES), lambda b, s: (b, s, 0)),
            ],
            out_specs=pl.BlockSpec((1, 1), lambda b, s: (0, 0)),
            scratch_shapes=[
                pltpu.VMEM((tile_rows, LANES), jnp.float32),  # focal partial sums
                pltpu.VMEM((tile_rows, LANES), jnp.float32),  # intersection partials
                pltpu.VMEM((tile_rows, LANES), jnp.float32),  # union partials
                pltpu.VMEM((1, 1), jnp.float32),              # dice-coefficient sum
            ],
        ),
        compiler_params=pltpu.CompilerParams(
            dimension_semantics=("arbitrary", "arbitrary")),
    )(pred_t, mask_t)
    return out[0, 0]


def _reference_loss(pred, mask):
    """Pure-JAX re-statement of the PyTorch forward (for validation)."""
    t = mask.astype(jnp.int32)
    t_f = t.astype(jnp.float32)
    logp = jax.nn.log_softmax(pred, axis=1)
    p = jnp.exp(logp)
    ce = -jnp.take_along_axis(logp, t[:, None], axis=1)[:, 0]
    p_t = jnp.take_along_axis(p, t[:, None], axis=1)[:, 0]
    focal = ce * (1.0 - p_t) ** GAMMA
    alpha_t = ALPHA * t_f + (1.0 - ALPHA) * (1.0 - t_f)
    focal_loss = jnp.mean(alpha_t * focal)

    p1 = p[:, 1]
    inter = jnp.sum(p1 * mask, axis=(1, 2))
    union = jnp.sum(p1, axis=(1, 2)) + jnp.sum(mask, axis=(1, 2))
    dice_coef = (2.0 * inter + SMOOTH) / (union + SMOOTH)
    dice_loss = 1.0 - jnp.mean(dice_coef)
    return dice_loss + focal_loss


if __name__ == "__main__":
    key = jax.random.PRNGKey(0)
    k_pred, k_mask = jax.random.split(key)

    B, C, H, W = 2, 2, 16, 16
    pred = jax.random.normal(k_pred, (B, C, H, W), dtype=jnp.float32)
    mask = (jax.random.uniform(k_mask, (B, H, W)) > 0.5).astype(jnp.float32)

    out = my_loss(pred, mask)
    out = jax.block_until_ready(out)

    ref = jax.block_until_ready(_reference_loss(pred, mask))
    np.testing.assert_allclose(np.asarray(out), np.asarray(ref),
                               rtol=1e-5, atol=1e-5)
    print("KERNEL_OK")
</pallas_src>

<mosaic_0001>
module attributes {stable_mosaic.version = 11 : i64} {
  func.func @kernel(%arg0: i32, %arg1: i32, %arg2: memref<1x2x2x128xf32, #tpu.memory_space<vmem>>, %arg3: memref<1x2x128xf32, #tpu.memory_space<vmem>>, %arg4: memref<1x1xf32, #tpu.memory_space<vmem>>, %arg5: memref<2x128xf32, #tpu.memory_space<vmem>>, %arg6: memref<2x128xf32, #tpu.memory_space<vmem>>, %arg7: memref<2x128xf32, #tpu.memory_space<vmem>>, %arg8: memref<1x1xf32, #tpu.memory_space<vmem>>) attributes {dimension_semantics = [#tpu.dimension_semantics<arbitrary>, #tpu.dimension_semantics<arbitrary>], iteration_bounds = array<i64: 2, 1>, scalar_prefetch = 0 : i64, scratch_operands = 4 : i64, tpu.core_type = #tpu.core_type<tc>, window_params = [{transform_indices = @transform_0, window_bounds = array<i64: 1, 2, 2, 128>}, {transform_indices = @transform_1, window_bounds = array<i64: 1, 2, 128>}, {pipeline_mode = #tpu.pipeline_mode<synchronous>, transform_indices = @transform_2, window_bounds = array<i64: 1, 1>}]} {
    %c0_i32 = arith.constant 0 : i32
    %0 = arith.cmpi eq, %arg0, %c0_i32 : i32
    %c0_i32_0 = arith.constant 0 : i32
    %1 = arith.cmpi eq, %arg1, %c0_i32_0 : i32
    %2 = arith.andi %0, %1 : i1
    %3 = arith.extui %2 : i1 to i32
    %c0_i32_1 = arith.constant 0 : i32
    %4 = arith.cmpi ne, %3, %c0_i32_1 : i32
    scf.if %4 {
      %cst_30 = arith.constant 0.000000e+00 : f32
      %53 = vector.broadcast %cst_30 : f32 to vector<2x128xf32>
      %c0_31 = arith.constant 0 : index
      %c0_32 = arith.constant 0 : index
      %54 = vector.load %arg5[%c0_31, %c0_32] : memref<2x128xf32, #tpu.memory_space<vmem>>, vector<2x128xf32>
      tpu.vector_store %arg5[%c0_31, %c0_32], %53 {strides = array<i32>} : memref<2x128xf32, #tpu.memory_space<vmem>>, vector<2x128xf32>,
      %cst_33 = arith.constant 0.000000e+00 : f32
      %55 = vector.broadcast %cst_33 : f32 to vector<1x1xf32>
      %c0_34 = arith.constant 0 : index
      %c0_35 = arith.constant 0 : index
      %56 = vector.load %arg8[%c0_34, %c0_35] : memref<1x1xf32, #tpu.memory_space<vmem>>, vector<1x1xf32>
      tpu.vector_store %arg8[%c0_34, %c0_35], %55 {strides = array<i32>} : memref<1x1xf32, #tpu.memory_space<vmem>>, vector<1x1xf32>,
    } else {
    }
    %c0_i32_2 = arith.constant 0 : i32
    %5 = arith.cmpi eq, %arg1, %c0_i32_2 : i32
    %6 = arith.extui %5 : i1 to i32
    %c0_i32_3 = arith.constant 0 : i32
    %7 = arith.cmpi ne, %6, %c0_i32_3 : i32
    scf.if %7 {
      %cst_30 = arith.constant 0.000000e+00 : f32
      %53 = vector.broadcast %cst_30 : f32 to vector<2x128xf32>
      %c0_31 = arith.constant 0 : index
      %c0_32 = arith.constant 0 : index
      %54 = vector.load %arg6[%c0_31, %c0_32] : memref<2x128xf32, #tpu.memory_space<vmem>>, vector<2x128xf32>
      tpu.vector_store %arg6[%c0_31, %c0_32], %53 {strides = array<i32>} : memref<2x128xf32, #tpu.memory_space<vmem>>, vector<2x128xf32>,
      %cst_33 = arith.constant 0.000000e+00 : f32
      %55 = vector.broadcast %cst_33 : f32 to vector<2x128xf32>
      %c0_34 = arith.constant 0 : index
      %c0_35 = arith.constant 0 : index
      %56 = vector.load %arg7[%c0_34, %c0_35] : memref<2x128xf32, #tpu.memory_space<vmem>>, vector<2x128xf32>
      tpu.vector_store %arg7[%c0_34, %c0_35], %55 {strides = array<i32>} : memref<2x128xf32, #tpu.memory_space<vmem>>, vector<2x128xf32>,
    } else {
    }
    %c0 = arith.constant 0 : index
    %c0_4 = arith.constant 0 : index
    %c0_5 = arith.constant 0 : index
    %c0_6 = arith.constant 0 : index
    %8 = vector.load %arg2[%c0, %c0_4, %c0_5, %c0_6] : memref<1x2x2x128xf32, #tpu.memory_space<vmem>>, vector<1x1x2x128xf32>
    %9 = vector.shape_cast %8 : vector<1x1x2x128xf32> to vector<2x128xf32>
    %c0_7 = arith.constant 0 : index
    %c1 = arith.constant 1 : index
    %c0_8 = arith.constant 0 : index
    %c0_9 = arith.constant 0 : index
    %10 = vector.load %arg2[%c0_7, %c1, %c0_8, %c0_9] : memref<1x2x2x128xf32, #tpu.memory_space<vmem>>, vector<1x1x2x128xf32>
    %11 = vector.shape_cast %10 : vector<1x1x2x128xf32> to vector<2x128xf32>
    %c0_10 = arith.constant 0 : index
    %c0_11 = arith.constant 0 : index
    %c0_12 = arith.constant 0 : index
    %12 = vector.load %arg3[%c0_10, %c0_11, %c0_12] : memref<1x2x128xf32, #tpu.memory_space<vmem>>, vector<1x2x128xf32>
    %13 = vector.shape_cast %12 : vector<1x2x128xf32> to vector<2x128xf32>
    %cst = arith.constant 5.000000e-01 : f32
    %14 = vector.broadcast %cst : f32 to vector<2x128xf32>
    %15 = arith.cmpf ogt, %13, %14 : vector<2x128xf32>
    %16 = arith.maximumf %9, %11 : vector<2x128xf32>
    %17 = arith.subf %9, %16 : vector<2x128xf32>
    %18 = math.exp %17 : vector<2x128xf32>
    %19 = arith.subf %11, %16 : vector<2x128xf32>
    %20 = math.exp %19 : vector<2x128xf32>
    %21 = arith.addf %18, %20 : vector<2x128xf32>
    %22 = tpu.reciprocal %21 : vector<2x128xf32> -> vector<2x128xf32>
    %23 = arith.mulf %20, %22 : vector<2x128xf32>
    %24 = arith.mulf %18, %22 : vector<2x128xf32>
    %25 = arith.select %15, %23, %24 : vector<2x128xi1>, vector<2x128xf32>
    %26 = arith.select %15, %11, %9 : vector<2x128xi1>, vector<2x128xf32>
    %27 = math.log %21 : vector<2x128xf32>
    %28 = arith.subf %16, %26 : vector<2x128xf32>
    %29 = arith.addf %27, %28 : vector<2x128xf32>
    %cst_13 = arith.constant 1.000000e+00 : f32
    %30 = vector.broadcast %cst_13 : f32 to vector<2x128xf32>
    %31 = arith.subf %30, %25 : vector<2x128xf32>
    %32 = arith.mulf %31, %31 : vector<2x128xf32>
    %33 = arith.mulf %29, %32 : vector<2x128xf32>
    %c0_14 = arith.constant 0 : index
    %c0_15 = arith.constant 0 : index
    %34 = vector.load %arg5[%c0_14, %c0_15] : memref<2x128xf32, #tpu.memory_space<vmem>>, vector<2x128xf32>
    %35 = arith.addf %34, %33 : vector<2x128xf32>
    %c0_16 = arith.constant 0 : index
    %c0_17 = arith.constant 0 : index
    %36 = vector.load %arg5[%c0_16, %c0_17] : memref<2x128xf32, #tpu.memory_space<vmem>>, vector<2x128xf32>
    tpu.vector_store %arg5[%c0_16, %c0_17], %35 {strides = array<i32>} : memref<2x128xf32, #tpu.memory_space<vmem>>, vector<2x128xf32>,
    %c0_18 = arith.constant 0 : index
    %c0_19 = arith.constant 0 : index
    %37 = vector.load %arg6[%c0_18, %c0_19] : memref<2x128xf32, #tpu.memory_space<vmem>>, vector<2x128xf32>
    %38 = arith.mulf %23, %13 : vector<2x128xf32>
    %39 = arith.addf %37, %38 : vector<2x128xf32>
    %c0_20 = arith.constant 0 : index
    %c0_21 = arith.constant 0 : index
    %40 = vector.load %arg6[%c0_20, %c0_21] : memref<2x128xf32, #tpu.memory_space<vmem>>, vector<2x128xf32>
    tpu.vector_store %arg6[%c0_20, %c0_21], %39 {strides = array<i32>} : memref<2x128xf32, #tpu.memory_space<vmem>>, vector<2x128xf32>,
    %c0_22 = arith.constant 0 : index
    %c0_23 = arith.constant 0 : index
    %41 = vector.load %arg7[%c0_22, %c0_23] : memref<2x128xf32, #tpu.memory_space<vmem>>, vector<2x128xf32>
    %42 = arith.addf %23, %13 : vector<2x128xf32>
    %43 = arith.addf %41, %42 : vector<2x128xf32>
    %c0_24 = arith.constant 0 : index
    %c0_25 = arith.constant 0 : index
    %44 = vector.load %arg7[%c0_24, %c0_25] : memref<2x128xf32, #tpu.memory_space<vmem>>, vector<2x128xf32>
    tpu.vector_store %arg7[%c0_24, %c0_25], %43 {strides = array<i32>} : memref<2x128xf32, #tpu.memory_space<vmem>>, vector<2x128xf32>,
    %c0_i32_26 = arith.constant 0 : i32
    %45 = arith.cmpi eq, %arg1, %c0_i32_26 : i32
    %46 = arith.extui %45 : i1 to i32
    %c0_i32_27 = arith.constant 0 : i32
    %47 = arith.cmpi ne, %46, %c0_i32_27 : i32
    scf.if %47 {
      %c0_30 = arith.constant 0 : index
      %c0_31 = arith.constant 0 : index
      %53 = vector.load %arg6[%c0_30, %c0_31] : memref<2x128xf32, #tpu.memory_space<vmem>>, vector<2x128xf32>
      %54 = vector.shape_cast %53 : vector<2x128xf32> to vector<1x2x128xf32>
      %cst_32 = arith.constant dense<0.000000e+00> : vector<1xf32>
      %55 = vector.multi_reduction <add>, %54, %cst_32 [1, 2] : vector<1x2x128xf32> to vector<1xf32>
      %56 = vector.shape_cast %55 : vector<1xf32> to vector<1x1x1xf32>
      %57 = vector.extract %56[0, 0, 0] : f32 from vector<1x1x1xf32>
      %58 = vector.broadcast %57 : f32 to vector<1x1xf32>
      %c0_33 = arith.constant 0 : index
      %c0_34 = arith.constant 0 : index
      %59 = vector.load %arg7[%c0_33, %c0_34] : memref<2x128xf32, #tpu.memory_space<vmem>>, vector<2x128xf32>
      %60 = vector.shape_cast %59 : vector<2x128xf32> to vector<1x2x128xf32>
      %cst_35 = arith.constant dense<0.000000e+00> : vector<1xf32>
      %61 = vector.multi_reduction <add>, %60, %cst_35 [1, 2] : vector<1x2x128xf32> to vector<1xf32>
      %62 = vector.shape_cast %61 : vector<1xf32> to vector<1x1x1xf32>
      %63 = vector.extract %62[0, 0, 0] : f32 from vector<1x1x1xf32>
      %64 = vector.broadcast %63 : f32 to vector<1x1xf32>
      %c0_36 = arith.constant 0 : index
      %c0_37 = arith.constant 0 : index
      %65 = vector.load %arg8[%c0_36, %c0_37] : memref<1x1xf32, #tpu.memory_space<vmem>>, vector<1x1xf32>
      %cst_38 = arith.constant 2.000000e+00 : f32
      %66 = vector.broadcast %cst_38 : f32 to vector<1x1xf32>
      %67 = arith.mulf %66, %58 : vector<1x1xf32>
      %cst_39 = arith.constant 9.99999997E-7 : f32
      %68 = vector.broadcast %cst_39 : f32 to vector<1x1xf32>
      %69 = arith.addf %67, %68 : vector<1x1xf32>
      %cst_40 = arith.constant 9.99999997E-7 : f32
      %70 = vector.broadcast %cst_40 : f32 to vector<1x1xf32>
      %71 = arith.addf %64, %70 : vector<1x1xf32>
      %72 = arith.divf %69, %71 : vector<1x1xf32>
      %73 = arith.addf %65, %72 : vector<1x1xf32>
      %c0_41 = arith.constant 0 : index
      %c0_42 = arith.constant 0 : index
      %74 = vector.load %arg8[%c0_41, %c0_42] : memref<1x1xf32, #tpu.memory_space<vmem>>, vector<1x1xf32>
      tpu.vector_store %arg8[%c0_41, %c0_42], %73 {strides = array<i32>} : memref<1x1xf32, #tpu.memory_space<vmem>>, vector<1x1xf32>,
    } else {
    }
    %c1_i32 = arith.constant 1 : i32
    %48 = arith.cmpi eq, %arg0, %c1_i32 : i32
    %c0_i32_28 = arith.constant 0 : i32
    %49 = arith.cmpi eq, %arg1, %c0_i32_28 : i32
    %50 = arith.andi %48, %49 : i1
    %51 = arith.extui %50 : i1 to i32
    %c0_i32_29 = arith.constant 0 : i32
    %52 = arith.cmpi ne, %51, %c0_i32_29 : i32
    scf.if %52 {
      %c0_30 = arith.constant 0 : index
      %c0_31 = arith.constant 0 : index
      %53 = vector.load %arg5[%c0_30, %c0_31] : memref<2x128xf32, #tpu.memory_space<vmem>>, vector<2x128xf32>
      %54 = vector.shape_cast %53 : vector<2x128xf32> to vector<1x2x128xf32>
      %cst_32 = arith.constant dense<0.000000e+00> : vector<1xf32>
      %55 = vector.multi_reduction <add>, %54, %cst_32 [1, 2] : vector<1x2x128xf32> to vector<1xf32>
      %56 = vector.shape_cast %55 : vector<1xf32> to vector<1x1x1xf32>
      %57 = vector.extract %56[0, 0, 0] : f32 from vector<1x1x1xf32>
      %58 = vector.broadcast %57 : f32 to vector<1x1xf32>
      %cst_33 = arith.constant 9.765625E-4 : f32
      %59 = vector.broadcast %cst_33 : f32 to vector<1x1xf32>
      %60 = arith.mulf %58, %59 : vector<1x1xf32>
      %c0_34 = arith.constant 0 : index
      %c0_35 = arith.constant 0 : index
      %61 = vector.load %arg8[%c0_34, %c0_35] : memref<1x1xf32, #tpu.memory_space<vmem>>, vector<1x1xf32>
      %cst_36 = arith.constant 5.000000e-01 : f32
      %62 = vector.broadcast %cst_36 : f32 to vector<1x1xf32>
      %63 = arith.mulf %61, %62 : vector<1x1xf32>
      %cst_37 = arith.constant 1.000000e+00 : f32
      %64 = vector.broadcast %cst_37 : f32 to vector<1x1xf32>
      %65 = arith.subf %64, %63 : vector<1x1xf32>
      %66 = arith.addf %65, %60 : vector<1x1xf32>
      %c0_38 = arith.constant 0 : index
      %c0_39 = arith.constant 0 : index
      %67 = vector.load %arg4[%c0_38, %c0_39] : memref<1x1xf32, #tpu.memory_space<vmem>>, vector<1x1xf32>
      tpu.vector_store %arg4[%c0_38, %c0_39], %66 {strides = array<i32>} : memref<1x1xf32, #tpu.memory_space<vmem>>, vector<1x1xf32>,
    } else {
    }
    return
  }
  func.func @transform_0(%arg0: i32, %arg1: i32) -> (i32, i32, i32, i32) {
    %c0_i32 = arith.constant 0 : i32
    %c0_i32_0 = arith.constant 0 : i32
    %c0_i32_1 = arith.constant 0 : i32
    return %arg0, %c0_i32, %arg1, %c0_i32_0 : i32, i32, i32, i32
  }
  func.func @transform_1(%arg0: i32, %arg1: i32) -> (i32, i32, i32) {
    %c0_i32 = arith.constant 0 : i32
    %c0_i32_0 = arith.constant 0 : i32
    return %arg0, %arg1, %c0_i32 : i32, i32, i32
  }
  func.func @transform_2(%arg0: i32, %arg1: i32) -> (i32, i32) {
    %c0_i32 = arith.constant 0 : i32
    %c0_i32_0 = arith.constant 0 : i32
    %c0_i32_1 = arith.constant 0 : i32
    return %c0_i32, %c0_i32_0 : i32, i32
  }
}

</mosaic_0001>

<bundles_post_ra>
// kernel: tpu_custom_call.1
= control target key start
LH: loop header
LB: loop body
LE: loop exit
PB: predicated region body
PF: predicated region fallthrough
CT: control target
= control target key end

     0   :  { %7 = vsyncpa [#allocation7], 0  ;;  %s834_s0 = inlined_call_operand.hbm [shape: f32[2,2,2,128], index: 0, kind: input, shape index: {}]   ;;  %s835_s1 = inlined_call_operand.hbm [shape: f32[2,2,128], index: 1, kind: input, shape index: {}]   ;;  %s836_s2 = inlined_call_operand.hbm [shape: f32[1,1], index: 2, kind: output, shape index: {}]  }
   0x1   :  { %9 = vsyncpa [#allocation7 + $0x1], 0 }
   0x2   :  { %10 = vsyncpa [#allocation10], 0 }
   0x3   :  { %12 = vsyncpa [#allocation10 + $0x1], 0 }
   0x4   :  { %13 = vsyncpa [#allocation8], 0  ;;  %s717_s9 = smov 0   ;;  %s719_s10 = smov 0  }
   0x5   :  { %s721_s11 = smov 0   ;;  %s723_s12 = smov 0  }
   0x6   :  { %s725_s13 = smov 0   ;;  %s727_s14 = smov 0  }
   0x7 LB: > { %s441_s15 = sadd.s32 4294967295, %s695_s14   ;;  %s31_s16 = sadd.s32 1, %s691_s13  ;;  %s695_s14 = sphi %s727_s14, %s19_s14   ;;  %s691_s13 = sphi %s725_s13, %s844_s13   ;;  %s687_s12 = sphi %s723_s12, %s843_s12   ;;  %s683_s11 = sphi %s721_s11, %s842_s11   ;;  %s679_s10 = sphi %s719_s10, %s841_s10   ;;  %s675_s9 = sphi %s717_s9, %s840_s9  }
   0x8   : > { %p33_p0 = scmp.ge.s32.totalorder %s31_s16, 2  ;;  %s40_s17 = sadd.s32 1, %s683_s11 }
   0x9   : > { %p47_p1 = scmp.ne.s32.totalorder %s683_s11, %s679_s10  ;;  %p48_p2 = scmp.eq.s32.totalorder %s695_s14, 0 }
   0xa   : > { %s846_s16 = smov (%p33_p0, %s31_s16), 0  ;;  %p53_p4 = scmp.ne.s32.totalorder %s679_s10, %s675_s9 }
   0xb   : > { %p753_p3 = por %p48_p2, %p47_p1  ;;  %s35_s19 = ssub.s32 %s691_s13, %s846_s16 }
   0xc   : > { %p54_p5 = scmp.eq.s32.totalorder %s441_s15, 0  ;;  %p38_p6 = scmp.eq.s32.totalorder %s35_s19, 0 }
   0xd   : > { %p483_p8 = scmp.lt.s32.totalorder %s695_s14, 2  ;;  %s126_s22 = sand.u32 1, %s683_s11  }
   0xe   : > { %p762_p7 = por %p54_p5, %p53_p4  ;;  %s459_s23 = sshll.u32 %s691_s13, 2 }
   0xf   : > { %s768_s21 = scalar_select %p38_p6, %s683_s11, %s40_s17  }
  0x10   : > { %s444_s24 = sshll.u32 %s126_s22, 2  ;;  %s136_s27 = scalar_lea.hbm %s834_s0, %s459_s23 }
  0x11   : > { %s137_s28 = sshll.u32 %s136_s27, 4  ;;  %s130_s29 = scalar_lea.vmem [#allocation6], %s444_s24  ;;  %s138_s28 = int_to_ptr.hbm [resolvable:$true] %s137_s28 }
  0x12   : > { %s139_s30 = sshll.u32 %s130_s29, 4  ;;  %p777_p9 = pnand %p483_p8, %p753_p3  ;;  %s140_s30 = int_to_ptr.vmem [resolvable:$true] %s139_s30 }
  0x13   : > { %p449_p10 = scmp.ge.s32.totalorder %s695_s14, 1  ;;  %p167_p11 = scmp.lt.s32.totalorder %s695_s14, 3 }
  0x14   : > { %s127_s4 = scalar_lea.sflag [#allocation7], %s126_s22  ;;  %s697_s5 = smov 32  }
  0x15   : > { %s698_s6 = smov 2   ;;  %p168_p12 = pnand %p449_p10, %p167_p11 }
  0x16   : > { %479 = dma.hbm_to_vmem [thread:$0]  (!%p777_p9), %s138_s28, 64, %s140_s30, %s127_s4, %s697_s5, %s697_s5, %s698_s6  }
  0x17   : > { %s447_s7 = sshll.u32 %s126_s22, 1  ;;  %s448_s8 = sshll.u32 %s691_s13, 1 }
  0x18   : > { %s158_s18 = scalar_lea.hbm %s835_s1, %s448_s8  ;;  %s153_s23 = scalar_lea.vmem [#allocation9], %s447_s7 }
  0x19   : > { %s160_s19 = sshll.u32 %s158_s18, 4  ;;  %s162_s24 = sshll.u32 %s153_s23, 4  ;;  %s161_s19 = int_to_ptr.hbm [resolvable:$true] %s160_s19  ;;  %s163_s24 = int_to_ptr.vmem [resolvable:$true] %s162_s24 }
  0x1a   : > { %s150_s25 = scalar_lea.sflag [#allocation10], %s126_s22  ;;  %171 = sbr.rel (%p168_p12) target bundleno = 322 (0x142), region = 28 }
  0x1b   : > { %482 = dma.hbm_to_vmem [thread:$0]  (!%p777_p9), %s161_s19, 32, %s163_s24, %s150_s25  }
  0x1c   : > { %s173_s26 = sand.u32 (!%p168_p12), 1, %s679_s10  }
  0x1d   : > { %s450_s27 = sshll.u32 (!%p168_p12), %s173_s26, 2  ;;  %s174_s28 = scalar_lea.sflag (!%p168_p12), [#allocation7], %s173_s26 }
  0x1e   : > { %s177_s29 = scalar_lea.vmem (!%p168_p12), [#allocation6], %s450_s27 }
  0x1f   : > { %662 = dma.done.wait (%p762_p7), %s174_s28, 64  }
  0x20   : > { %664 = vsyncadd (%p762_p7), %s174_s28, 4294967232  ;;  %s451_s30 = sshll.u32 %s173_s26, 1  ;;  %s184_s4 = scalar_lea.sflag [#allocation10], %s173_s26 }
  0x21   : > { %s187_s5 = scalar_lea.vmem [#allocation9], %s451_s30 }
  0x22   : > { %666 = dma.done.wait (%p762_p7), %s184_s4, 32  }
  0x23   : > { %668 = vsyncadd (%p762_p7), %s184_s4, 4294967264  ;;  %p209_p13 = scmp.eq.s32.totalorder %s687_s12, 0 }
  0x24   : > { %vm216_vm0 = vcmask (%p209_p13), 0   ;;  %v699_v0 = vmov (%p209_p13), 0.0  }
  0x25   : > { %214 = sbr.rel (!%p209_p13) target bundleno = 42 (0x2a), region = 40  ;;  %215 = vst [vmem:[#allocation2] sm:$0x3] (%p209_p13), %v699_v0 }
  0x26   : > { %217 = vst.msk [vmem:[#allocation5] sm:$0x1] (%p209_p13), %vm216_vm0, %v699_v0 }
  0x2a PF: > { %v223_v1 = vld [vmem:[%s177_s29] sm:$0x3]  ;;  %v453_v2 = vld [vmem:[%s177_s29 + $0x2] sm:$0x3]  ;;  %v700_v3 = vmov 0.0   ;;  %vm276_vm6 = vcmask 1041408  }
  0x2b   : > { %221 = vst [vmem:[#allocation3] sm:$0x3] %v700_v3  ;;  %v228_v4 = vmax.f32 %v223_v1, %v453_v2  ;;  %v226_v15 = vld [vmem:[%s187_s5] sm:$0x3]  ;;  %p322_p0 = scmp.eq.s32.totalorder %s687_s12, 1  ;;  %vm320_vm11 = vcmask 0  }
  0x2c   : > { %222 = vst [vmem:[#allocation4] sm:$0x3] %v700_v3  ;;  %vm227_vm3 = vcmp.gt.f32.partialorder %v226_v15, 0.5  ;;  %v261_v39 = vld [vmem:[#allocation2] sm:$0x3] }
  0x2d   : > { %v229_v5 = vsub.f32 %v223_v1, %v228_v4  ;;  %v232_v6 = vsub.f32 %v453_v2, %v228_v4  ;;  %v253_v22 = vsel %vm227_vm3, %v453_v2, %v223_v1 }
  0x2e   : > { %v256_v26 = vsub.f32 %v228_v4, %v253_v22 }
  0x2f   : > { %v230_v7 = vmul.f32 1.442695, %v229_v5  ;;  %v233_v8 = vmul.f32 1.442695, %v232_v6 }
  0x31   : > { %539 = vpow2.f32 %v230_v7 }
  0x32   : > { %541 = vpow2.f32 %v233_v8  ;;  %v264_v29 = vld [vmem:[#allocation3] sm:$0x3] }
  0x33   : > { %v268_v30 = vld [vmem:[#allocation4] sm:$0x3] }
  0x37   : > { %v540_v9 = vpop.eup %539 }
  0x38   : > { %v542_v10 = vpop.eup %541 }
  0x39   : > { %v235_v11 = vadd.f32 %v542_v10, %v540_v9 }
  0x3b   : > { %543 = vrcp.f32 %v235_v11  ;;  %v247_v14 = vand.u32 2147483648, %v235_v11  ;;  %vm241_vm1 = vweird.f32 %v235_v11  ;;  %v245_v17 = vand.u32 2147483647, %v235_v11 }
  0x3c   : > { %545 = vlog2.f32 %v235_v11 }
  0x3d   : > { %v248_v19 = vor.u32 1.1754944e-38, %v247_v14  ;;  %vm246_vm5 = vcmp.eq.f32.partialorder %v245_v17, 8.507059e+37 }
  0x41   : > { %v544_v12 = vpop.eup %543 }
  0x42   : > { %v237_v13 = vmul.f32 %v544_v12, %v235_v11  ;;  %vm242_vm2 = vweird.f32 %v544_v12  ;;  %v546_v20 = vpop.eup %545 }
  0x43   : > { %vm243_vm4 = vmor %vm241_vm1, %vm242_vm2  ;;  %v255_v25 = vmul.f32 0.6931472, %v546_v20 }
  0x44   : > { %v238_v16 = vsub.f32 1.0, %v237_v13 }
  0x45   : > { %v257_v34 = vadd.f32 %v256_v26, %v255_v25 }
  0x46   : > { %v239_v18 = vmul.f32 %v544_v12, %v238_v16 }
  0x48   : > { %v240_v21 = vadd.f32 %v544_v12, %v239_v18 }
  0x4a   : > { %v244_v23 = vsel %vm243_vm4, %v544_v12, %v240_v21 }
  0x4b   : > { %v249_v24 = vsel %vm246_vm5, %v248_v19, %v244_v23 }
  0x4c   : > { %v250_v27 = vmul.f32 %v542_v10, %v249_v24  ;;  %v251_v28 = vmul.f32 %v540_v9, %v249_v24  ;;  %v300_v10 = vld [vmem:[#allocation5] sm:$0x1] }
  0x4e   : > { %v252_v31 = vsel %vm227_vm3, %v250_v27, %v251_v28  ;;  %v265_v32 = vmul.f32 %v250_v27, %v226_v15  ;;  %v269_v33 = vadd.f32 %v250_v27, %v226_v15 }
  0x4f   : > { %v258_v35 = vsub.f32 1.0, %v252_v31 }
  0x50   : > { %v266_v36 = vadd.f32 %v265_v32, %v264_v29  ;;  %v270_v37 = vadd.f32 %v269_v33, %v268_v30 }
  0x51   : > { %v259_v38 = vmul.f32 %v258_v35, %v258_v35 }
  0x52   : > { %267 = vst [vmem:[#allocation3] sm:$0x3] %v266_v36 }
  0x53   : > { %v260_v40 = vmul.f32 %v259_v38, %v257_v34  ;;  %271 = vst [vmem:[#allocation4] sm:$0x3] %v270_v37 }
  0x55   : > { %v262_v41 = vadd.f32 %v261_v39, %v260_v40 }
  0x57   : > { %263 = vst [vmem:[#allocation2] sm:$0x3] %v262_v41 }
  0x59   : > { %v275_v42 = vld [vmem:[#allocation3] sm:$0x3] }
  0x5a   : > { %v277_v43 = vsel %vm276_vm6, %v275_v42, 0.0  ;;  %v288_v44 = vld [vmem:[#allocation4] sm:$0x3] }
  0x5b   : > { %278 = vadd.xlane.f32.xlu0 %v277_v43  ;;  %v289_v45 = vsel %vm276_vm6, %v288_v44, 0.0 }
  0x5e   : > { %v327_v14 = vld [vmem:[#allocation2] sm:$0x3] (%p322_p0) }
  0x5f   : > { %v329_v15 = vsel (%p322_p0), %vm276_vm6, %v327_v14, 0.0 }
  0x63   : > { %290 = vadd.xlane.f32.xlu0 %v289_v45 }
  0x6b   : > { %330 = vadd.xlane.f32.xlu0 (%p322_p0), %v329_v15 }
  0xce   : > { %v279_v46 = vpop.xlane.xlu0 %278 }
  0xcf   : > { %v280_v47 = vrot.slane %v279_v46, 4 }
  0xd1   : > { %v281_v48 = vadd.f32 %v280_v47, %v279_v46 }
  0xd3   : > { %v282_v49 = vrot.slane %v281_v48, 2 }
  0xd5   : > { %v283_v50 = vadd.f32 %v282_v49, %v281_v48 }
  0xd6   : > { %v291_v51 = vpop.xlane.xlu0 %290 }
  0xd7   : > { %v292_v52 = vrot.slane %v291_v51, 4  ;;  %v284_v53 = vrot.slane %v283_v50, 1 }
  0xd9   : > { %v293_v54 = vadd.f32 %v292_v52, %v291_v51  ;;  %v285_v55 = vadd.f32 %v284_v53, %v283_v50 }
  0xdb   : > { %v294_v56 = vrot.slane %v293_v54, 2  ;;  %462 = vpush %v285_v55 }
  0xdd   : > { %v295_v57 = vadd.f32 %v294_v56, %v293_v54 }
  0xde   : > { %v331_v16 = vpop.xlane.xlu0 (%p322_p0), %330 }
  0xdf   : > { %v296_v58 = vrot.slane %v295_v57, 1  ;;  %v332_v17 = vrot.slane (%p322_p0), %v331_v16, 4 }
  0xe1   : > { %v297_v59 = vadd.f32 %v296_v58, %v295_v57  ;;  %v333_v18 = vadd.f32 (%p322_p0), %v332_v17, %v331_v16 }
  0xe3   : > { %464 = vpush %v297_v59  ;;  %v334_v19 = vrot.slane (%p322_p0), %v333_v18, 2 }
  0xe5   : > { %v335_v20 = vadd.f32 (%p322_p0), %v334_v19, %v333_v18 }
  0xe7   : > { %v336_v21 = vrot.slane (%p322_p0), %v335_v20, 1 }
  0xe9   : > { %v337_v22 = vadd.f32 (%p322_p0), %v336_v21, %v335_v20 }
  0xeb   : > { %466 = vpush (%p322_p0), %v337_v22 }
 0x10c   : > { %s463_s20 = spop %462 }
 0x10d   : > { %v287_v0 = vstv %s463_s20 }
 0x10e   : > { %v301_v3 = vmul.f32 2.0, %v287_v0 }
 0x110   : > { %v302_v8 = vadd.f32 1e-06, %v301_v3 }
 0x114   : > { %s465_s22 = spop %464 }
 0x115   : > { %v299_v60 = vstv %s465_s22 }
 0x116   : > { %v303_v61 = vadd.f32 1e-06, %v299_v60 }
 0x118   : > { %547 = vrcp.f32 %v303_v61  ;;  %v315_v2 = vand.u32 2147483648, %v303_v61  ;;  %v313_v5 = vand.u32 2147483647, %v303_v61  ;;  %vm309_vm8 = vweird.f32 %v303_v61 }
 0x11a   : > { %v316_v7 = vor.u32 1.1754944e-38, %v315_v2  ;;  %vm314_vm10 = vcmp.eq.f32.partialorder %v313_v5, 8.507059e+37 }
 0x11c   : > { %s467_s3 = spop (%p322_p0), %466 }
 0x11d   : > { %v339_v26 = vstv (%p322_p0), %s467_s3 }
 0x11e   : > { %v548_v62 = vpop.eup %547  ;;  %v340_v27 = vmul.f32 (%p322_p0), 0.0009765625, %v339_v26 }
 0x11f   : > { %v305_v63 = vmul.f32 %v548_v62, %v303_v61  ;;  %vm310_vm7 = vweird.f32 %v548_v62 }
 0x120   : > { %vm311_vm9 = vmor %vm309_vm8, %vm310_vm7 }
 0x121   : > { %v306_v1 = vsub.f32 1.0, %v305_v63 }
 0x123   : > { %v307_v4 = vmul.f32 %v548_v62, %v306_v1 }
 0x125   : > { %v308_v6 = vadd.f32 %v548_v62, %v307_v4 }
 0x127   : > { %v312_v9 = vsel %vm311_vm9, %v548_v62, %v308_v6 }
 0x128   : > { %v317_v11 = vsel %vm314_vm10, %v316_v7, %v312_v9 }
 0x129   : > { %v318_v12 = vmul.f32 %v317_v11, %v302_v8  ;;  %326 = sbr.rel (!%p322_p0) target bundleno = 316 (0x13c), region = 52 }
 0x12b   : > { %v319_v13 = vadd.f32 %v318_v12, %v300_v10 }
 0x12d   : > { %321 = vst.msk [vmem:[#allocation5] sm:$0x1] %vm320_vm11, %v319_v13 }
 0x134   : > { %v341_v23 = vld [vmem:[#allocation5] sm:$0x1] }
 0x135   : > { %v342_v24 = vmul.f32 0.5, %v341_v23 }
 0x137   : > { %v343_v25 = vsub.f32 1.0, %v342_v24 }
 0x139   : > { %v344_v28 = vadd.f32 %v343_v25, %v340_v27 }
 0x13b   : > { %346 = vst.msk [vmem:[#allocation11] sm:$0x1] %vm320_vm11, %v344_v28 }
 0x13c PF: > { %p484_p1 = scmp.eq.s32.totalorder %s441_s15, 1  ;;  %s355_s7 = sshll.u32 %s836_s2, 4  ;;  %s356_s7 = int_to_ptr.hbm [resolvable:$true] %s355_s7 }
 0x13d   : > { %s701_s8 = smov [#allocation11]  }
 0x13e   : > { %s353_s9 = sshll.u32 %s701_s8, 4  ;;  %s354_s9 = int_to_ptr.vmem [resolvable:$true] %s353_s9 }
 0x13f   : > { %473 = dma.vmem_to_hbm [thread:$0]  (%p484_p1), %s354_s9, 16, %s356_s7, [#allocation8]  }
 0x140   : > { %670 = dma.done.wait (%p484_p1), [#allocation8], 16  }
 0x141   : > { %672 = vsyncadd (%p484_p1), [#allocation8], 4294967280 }
 0x142 PF: > { %s19_s14 = sadd.s32 1, %s695_s14   ;;  %s840_s9 = smov %s679_s10 }
 0x143   : > { %p16_p2 = scmp.ge.s32.totalorder %s19_s14, 4   ;;  %s841_s10 = smov %s683_s11 }
 0x144   : > { %s842_s11 = smov %s768_s21  ;;  %s843_s12 = smov %s691_s13 }
 0x145   : > { %s844_s13 = smov %s846_s16  ;;  %18 = sbr.rel (!%p16_p2) target bundleno = 7 (0x7), region = 95 }
 0x14a   :  { %369 = vsyncpa [#allocation7], 1 }
 0x14b   :  { %371 = vsyncpa [#allocation7 + $0x1], 1 }
 0x14c   :  { %372 = vsyncpa [#allocation10], 1 }
 0x14d   :  { %374 = vsyncpa [#allocation10 + $0x1], 1 }
 0x14e   :  { %375 = vsyncpa [#allocation8], 1 }
 0x14f   :  { %377 = vsyncpa [#allocation8 + $0x1], 1 }

</bundles_post_ra>
